<compile_context>
chip_gen: v7x
topology: tpu7x:2x2x1
jax: 0.10.0
libtpu: 0.0.40
codegen_flags: <defaults>
</compile_context>

<pallas_src>
import jax
import jax.numpy as jnp
from jax import lax
from jax.experimental import pallas as pl
from jax.experimental.pallas import tpu as pltpu

BERT_EMB = 384
HIDDEN_DIM = 256
MID_DIM = 256
OUT_DIM = 128
COS_EPS = 1e-8          # torch.cosine_similarity default eps
DEFAULT_TB = 512        # batch tile (multiple of 16 for bf16 sublane packing)


def dssm_kernel(q_ref, d_ref,
                w1_ref, b1_ref, w2_ref, b2_ref, w3_ref, b3_ref,
                out_ref):
    """One batch tile: shared 3-layer MLP on both towers (stacked), then
    cosine similarity along the feature axis."""
    tb = q_ref.shape[0]

    # Stack query + doc tiles -> one matmul per layer ([2*TB, 384] @ W).
    x = jnp.concatenate([q_ref[...], d_ref[...]], axis=0)            # bf16 [2TB,384]

    h = jnp.dot(x, w1_ref[...], preferred_element_type=jnp.float32) + b1_ref[...]
    h = jnp.maximum(h, 0.0).astype(jnp.bfloat16)                     # ReLU (f32) -> bf16
    h = jnp.dot(h, w2_ref[...], preferred_element_type=jnp.float32) + b2_ref[...]
    h = jnp.maximum(h, 0.0).astype(jnp.bfloat16)
    e = jnp.dot(h, w3_ref[...], preferred_element_type=jnp.float32) + b3_ref[...]

    qe = e[:tb]                                                      # f32 [TB,128]
    de = e[tb:]                                                      # f32 [TB,128]

    # torch.cosine_similarity(q, d, dim=1) == w12 / sqrt(max(w11*w22, eps^2))
    w12 = jnp.sum(qe * de, axis=-1, keepdims=True)                   # [TB,1]
    w11 = jnp.sum(qe * qe, axis=-1, keepdims=True)
    w22 = jnp.sum(de * de, axis=-1, keepdims=True)
    inv = lax.rsqrt(jnp.maximum(w11 * w22, COS_EPS * COS_EPS))       # EUP rsqrt
    out_ref[...] = w12 * inv


def dssm_forward(query, doc, params, *, tb=DEFAULT_TB):
    """query, doc: [B, 384] float32. Returns cosine similarity [B] (float32)."""
    w1, b1, w2, b2, w3, b3 = params
    B = query.shape[0]

    # Pick a (8,128)-legal, bf16-packing-friendly batch tile and pad B to it.
    tb = max(16, ((int(tb) + 15) // 16) * 16)
    if B < tb:
        tb = max(16, ((B + 15) // 16) * 16)
    b_pad = ((B + tb - 1) // tb) * tb
    if b_pad != B:
        pad = b_pad - B
        query = jnp.pad(query, ((0, pad), (0, 0)))
        doc = jnp.pad(doc, ((0, pad), (0, 0)))

    # bf16 on the MXU / HBM path; biases stay f32 (added to f32 accumulators).
    q_bf = query.astype(jnp.bfloat16)
    d_bf = doc.astype(jnp.bfloat16)
    w1b = w1.astype(jnp.bfloat16)
    w2b = w2.astype(jnp.bfloat16)
    w3b = w3.astype(jnp.bfloat16)

    grid = (b_pad // tb,)

    layer_macs = BERT_EMB * HIDDEN_DIM + HIDDEN_DIM * MID_DIM + MID_DIM * OUT_DIM
    cost = pl.CostEstimate(
        flops=4 * b_pad * layer_macs,          # 2 towers * 2 flops/MAC
        transcendentals=b_pad,                 # one rsqrt per row
        bytes_accessed=(2 * b_pad * BERT_EMB * 2            # bf16 inputs
                        + 2 * layer_macs                     # bf16 weights
                        + (HIDDEN_DIM + MID_DIM + OUT_DIM) * 4
                        + b_pad * 4),                        # f32 output
    )

    out = pl.pallas_call(
        dssm_kernel,
        out_shape=jax.ShapeDtypeStruct((b_pad, 1), jnp.float32),
        grid=grid,
        in_specs=[
            pl.BlockSpec((tb, BERT_EMB), lambda i: (i, 0)),          # query tile
            pl.BlockSpec((tb, BERT_EMB), lambda i: (i, 0)),          # doc tile
            pl.BlockSpec((BERT_EMB, HIDDEN_DIM), lambda i: (0, 0)),  # W1 (resident)
            pl.BlockSpec((1, HIDDEN_DIM), lambda i: (0, 0)),         # b1
            pl.BlockSpec((HIDDEN_DIM, MID_DIM), lambda i: (0, 0)),   # W2
            pl.BlockSpec((1, MID_DIM), lambda i: (0, 0)),            # b2
            pl.BlockSpec((MID_DIM, OUT_DIM), lambda i: (0, 0)),      # W3
            pl.BlockSpec((1, OUT_DIM), lambda i: (0, 0)),            # b3
        ],
        out_specs=pl.BlockSpec((tb, 1), lambda i: (i, 0)),
        compiler_params=pltpu.CompilerParams(
            dimension_semantics=("parallel",)),
        cost_estimate=cost,
    )(q_bf, d_bf, w1b, b1, w2b, b2, w3b, b3)

    return out[:B, 0]


def init_params(key):
    """Deterministic parameter init (shapes match the nn.Linear layers)."""
    k1, k2, k3, k4, k5, k6 = jax.random.split(key, 6)

    def uniform(k, shape, fan_in):
        bound = 1.0 / jnp.sqrt(fan_in)
        return jax.random.uniform(k, shape, jnp.float32, -bound, bound)

    w1 = uniform(k1, (BERT_EMB, HIDDEN_DIM), BERT_EMB)     # Linear(384, 256)
    b1 = uniform(k2, (1, HIDDEN_DIM), BERT_EMB)
    w2 = uniform(k3, (HIDDEN_DIM, MID_DIM), HIDDEN_DIM)    # Linear(256, 256)
    b2 = uniform(k4, (1, MID_DIM), HIDDEN_DIM)
    w3 = uniform(k5, (MID_DIM, OUT_DIM), MID_DIM)          # Linear(256, 128)
    b3 = uniform(k6, (1, OUT_DIM), MID_DIM)
    return (w1, b1, w2, b2, w3, b3)


def dssm_ref(query, doc, params):
    """Pure-JAX f32 reference for correctness checking."""
    w1, b1, w2, b2, w3, b3 = params

    def mlp(x):
        h = jnp.maximum(x @ w1 + b1, 0.0)
        h = jnp.maximum(h @ w2 + b2, 0.0)
        return h @ w3 + b3

    qe, de = mlp(query), mlp(doc)
    w12 = jnp.sum(qe * de, axis=-1)
    w11 = jnp.sum(qe * qe, axis=-1)
    w22 = jnp.sum(de * de, axis=-1)
    return w12 / jnp.sqrt(jnp.maximum(w11 * w22, COS_EPS * COS_EPS))


if __name__ == "__main__":
    key = jax.random.PRNGKey(0)
    kp, kq, kd = jax.random.split(key, 3)
    params = init_params(kp)

    # Small case: single grid step (B padded to one 16-row tile).
    B = 8
    query = jax.random.normal(kq, (B, BERT_EMB), jnp.float32)
    doc = jax.random.normal(kd, (B, BERT_EMB), jnp.float32)
    out = jax.block_until_ready(dssm_forward(query, doc, params))
    ref = dssm_ref(query, doc, params)
    assert out.shape == (B,)
    # bf16 MXU path -> relaxed tolerance vs f32 reference (cos-sim in [-1,1]).
    assert jnp.allclose(out, ref, atol=2e-2), (out, ref)

    # Exercise the multi-step grid + tail padding path with a small tile.
    B2 = 40
    q2 = jax.random.normal(jax.random.PRNGKey(1), (B2, BERT_EMB), jnp.float32)
    d2 = jax.random.normal(jax.random.PRNGKey(2), (B2, BERT_EMB), jnp.float32)
    out2 = jax.block_until_ready(dssm_forward(q2, d2, params, tb=16))
    ref2 = dssm_ref(q2, d2, params)
    assert out2.shape == (B2,)
    assert jnp.allclose(out2, ref2, atol=2e-2), (out2, ref2)

    print("KERNEL_OK")
</pallas_src>

<mosaic_0001>
module attributes {stable_mosaic.version = 11 : i64} {
  func.func @dssm_kernel(%arg0: i32, %arg1: memref<16x384xbf16, #tpu.memory_space<vmem>>, %arg2: memref<16x384xbf16, #tpu.memory_space<vmem>>, %arg3: memref<384x256xbf16, #tpu.memory_space<vmem>>, %arg4: memref<1x256xf32, #tpu.memory_space<vmem>>, %arg5: memref<256x256xbf16, #tpu.memory_space<vmem>>, %arg6: memref<1x256xf32, #tpu.memory_space<vmem>>, %arg7: memref<256x128xbf16, #tpu.memory_space<vmem>>, %arg8: memref<1x128xf32, #tpu.memory_space<vmem>>, %arg9: memref<16x1xf32, #tpu.memory_space<vmem>>) attributes {dimension_semantics = [#tpu.dimension_semantics<parallel>], iteration_bounds = array<i64: 1>, scalar_prefetch = 0 : i64, scratch_operands = 0 : i64, tpu.core_type = #tpu.core_type<tc>, window_params = [{transform_indices = @transform_0, window_bounds = array<i64: 16, 384>}, {transform_indices = @transform_1, window_bounds = array<i64: 16, 384>}, {pipeline_mode = #tpu.pipeline_mode<synchronous>, transform_indices = @transform_2, window_bounds = array<i64: 384, 256>}, {pipeline_mode = #tpu.pipeline_mode<synchronous>, transform_indices = @transform_3, window_bounds = array<i64: 1, 256>}, {pipeline_mode = #tpu.pipeline_mode<synchronous>, transform_indices = @transform_4, window_bounds = array<i64: 256, 256>}, {pipeline_mode = #tpu.pipeline_mode<synchronous>, transform_indices = @transform_5, window_bounds = array<i64: 1, 256>}, {pipeline_mode = #tpu.pipeline_mode<synchronous>, transform_indices = @transform_6, window_bounds = array<i64: 256, 128>}, {pipeline_mode = #tpu.pipeline_mode<synchronous>, transform_indices = @transform_7, window_bounds = array<i64: 1, 128>}, {transform_indices = @transform_8, window_bounds = array<i64: 16, 1>}]} {
    %c0 = arith.constant 0 : index
    %c0_0 = arith.constant 0 : index
    %0 = vector.load %arg1[%c0, %c0_0] : memref<16x384xbf16, #tpu.memory_space<vmem>>, vector<16x384xbf16>
    %c0_1 = arith.constant 0 : index
    %c0_2 = arith.constant 0 : index
    %1 = vector.load %arg2[%c0_1, %c0_2] : memref<16x384xbf16, #tpu.memory_space<vmem>>, vector<16x384xbf16>
    %2 = tpu.concatenate %0, %1 in 0 : vector<16x384xbf16>, vector<16x384xbf16> -> vector<32x384xbf16>
    %c0_3 = arith.constant 0 : index
    %c0_4 = arith.constant 0 : index
    %3 = vector.load %arg3[%c0_3, %c0_4] : memref<384x256xbf16, #tpu.memory_space<vmem>>, vector<384x256xbf16>
    %cst = arith.constant dense<0.000000e+00> : vector<32x256xf32>
    %4 = tpu.matmul %2, %3, %cst {dimension_numbers = #tpu.dot_dimension_numbers<[1], [0], [0], [1], [0, 0, 1, 1], [], []>} : vector<32x384xbf16>, vector<384x256xbf16>, vector<32x256xf32> -> vector<32x256xf32>
    %c0_5 = arith.constant 0 : index
    %c0_6 = arith.constant 0 : index
    %5 = vector.load %arg4[%c0_5, %c0_6] : memref<1x256xf32, #tpu.memory_space<vmem>>, vector<1x256xf32>
    %6 = vector.broadcast %5 : vector<1x256xf32> to vector<32x256xf32>
    %7 = arith.addf %4, %6 : vector<32x256xf32>
    %cst_7 = arith.constant 0.000000e+00 : f32
    %8 = vector.broadcast %cst_7 : f32 to vector<32x256xf32>
    %9 = arith.maximumf %7, %8 : vector<32x256xf32>
    %10 = arith.truncf %9 : vector<32x256xf32> to vector<32x256xbf16>
    %c0_8 = arith.constant 0 : index
    %c0_9 = arith.constant 0 : index
    %11 = vector.load %arg5[%c0_8, %c0_9] : memref<256x256xbf16, #tpu.memory_space<vmem>>, vector<256x256xbf16>
    %cst_10 = arith.constant dense<0.000000e+00> : vector<32x256xf32>
    %12 = tpu.matmul %10, %11, %cst_10 {dimension_numbers = #tpu.dot_dimension_numbers<[1], [0], [0], [1], [0, 0, 1, 1], [], []>} : vector<32x256xbf16>, vector<256x256xbf16>, vector<32x256xf32> -> vector<32x256xf32>
    %c0_11 = arith.constant 0 : index
    %c0_12 = arith.constant 0 : index
    %13 = vector.load %arg6[%c0_11, %c0_12] : memref<1x256xf32, #tpu.memory_space<vmem>>, vector<1x256xf32>
    %14 = vector.broadcast %13 : vector<1x256xf32> to vector<32x256xf32>
    %15 = arith.addf %12, %14 : vector<32x256xf32>
    %cst_13 = arith.constant 0.000000e+00 : f32
    %16 = vector.broadcast %cst_13 : f32 to vector<32x256xf32>
    %17 = arith.maximumf %15, %16 : vector<32x256xf32>
    %18 = arith.truncf %17 : vector<32x256xf32> to vector<32x256xbf16>
    %c0_14 = arith.constant 0 : index
    %c0_15 = arith.constant 0 : index
    %19 = vector.load %arg7[%c0_14, %c0_15] : memref<256x128xbf16, #tpu.memory_space<vmem>>, vector<256x128xbf16>
    %cst_16 = arith.constant dense<0.000000e+00> : vector<32x128xf32>
    %20 = tpu.matmul %18, %19, %cst_16 {dimension_numbers = #tpu.dot_dimension_numbers<[1], [0], [0], [1], [0, 0, 1, 1], [], []>} : vector<32x256xbf16>, vector<256x128xbf16>, vector<32x128xf32> -> vector<32x128xf32>
    %c0_17 = arith.constant 0 : index
    %c0_18 = arith.constant 0 : index
    %21 = vector.load %arg8[%c0_17, %c0_18] : memref<1x128xf32, #tpu.memory_space<vmem>>, vector<1x128xf32>
    %22 = vector.broadcast %21 : vector<1x128xf32> to vector<32x128xf32>
    %23 = arith.addf %20, %22 : vector<32x128xf32>
    %24 = vector.extract_strided_slice %23 {offsets = [0, 0], sizes = [16, 128], strides = [1, 1]} : vector<32x128xf32> to vector<16x128xf32>
    %25 = vector.extract_strided_slice %23 {offsets = [16, 0], sizes = [16, 128], strides = [1, 1]} : vector<32x128xf32> to vector<16x128xf32>
    %26 = arith.mulf %24, %25 : vector<16x128xf32>
    %cst_19 = arith.constant dense<0.000000e+00> : vector<16xf32>
    %27 = vector.multi_reduction <add>, %26, %cst_19 [1] : vector<16x128xf32> to vector<16xf32>
    %28 = vector.shape_cast %27 : vector<16xf32> to vector<16x1xf32>
    %29 = arith.mulf %24, %24 : vector<16x128xf32>
    %cst_20 = arith.constant dense<0.000000e+00> : vector<16xf32>
    %30 = vector.multi_reduction <add>, %29, %cst_20 [1] : vector<16x128xf32> to vector<16xf32>
    %31 = vector.shape_cast %30 : vector<16xf32> to vector<16x1xf32>
    %32 = arith.mulf %25, %25 : vector<16x128xf32>
    %cst_21 = arith.constant dense<0.000000e+00> : vector<16xf32>
    %33 = vector.multi_reduction <add>, %32, %cst_21 [1] : vector<16x128xf32> to vector<16xf32>
    %34 = vector.shape_cast %33 : vector<16xf32> to vector<16x1xf32>
    %35 = arith.mulf %31, %34 : vector<16x1xf32>
    %cst_22 = arith.constant 1.000000e-16 : f32
    %36 = vector.broadcast %cst_22 : f32 to vector<16x1xf32>
    %37 = arith.maximumf %35, %36 : vector<16x1xf32>
    %38 = math.rsqrt %37 : vector<16x1xf32>
    %39 = arith.mulf %28, %38 : vector<16x1xf32>
    %c0_23 = arith.constant 0 : index
    %c0_24 = arith.constant 0 : index
    %40 = vector.load %arg9[%c0_23, %c0_24] : memref<16x1xf32, #tpu.memory_space<vmem>>, vector<16x1xf32>
    tpu.vector_store %arg9[%c0_23, %c0_24], %39 {strides = array<i32>} : memref<16x1xf32, #tpu.memory_space<vmem>>, vector<16x1xf32>,
    return
  }
  func.func @transform_0(%arg0: i32) -> (i32, i32) {
    %c0_i32 = arith.constant 0 : i32
    %c0_i32_0 = arith.constant 0 : i32
    return %arg0, %c0_i32 : i32, i32
  }
  func.func @transform_1(%arg0: i32) -> (i32, i32) {
    %c0_i32 = arith.constant 0 : i32
    %c0_i32_0 = arith.constant 0 : i32
    return %arg0, %c0_i32 : i32, i32
  }
  func.func @transform_2(%arg0: i32) -> (i32, i32) {
    %c0_i32 = arith.constant 0 : i32
    %c0_i32_0 = arith.constant 0 : i32
    %c0_i32_1 = arith.constant 0 : i32
    return %c0_i32, %c0_i32_0 : i32, i32
  }
  func.func @transform_3(%arg0: i32) -> (i32, i32) {
    %c0_i32 = arith.constant 0 : i32
    %c0_i32_0 = arith.constant 0 : i32
    %c0_i32_1 = arith.constant 0 : i32
    return %c0_i32, %c0_i32_0 : i32, i32
  }
  func.func @transform_4(%arg0: i32) -> (i32, i32) {
    %c0_i32 = arith.constant 0 : i32
    %c0_i32_0 = arith.constant 0 : i32
    %c0_i32_1 = arith.constant 0 : i32
    return %c0_i32, %c0_i32_0 : i32, i32
  }
  func.func @transform_5(%arg0: i32) -> (i32, i32) {
    %c0_i32 = arith.constant 0 : i32
    %c0_i32_0 = arith.constant 0 : i32
    %c0_i32_1 = arith.constant 0 : i32
    return %c0_i32, %c0_i32_0 : i32, i32
  }
  func.func @transform_6(%arg0: i32) -> (i32, i32) {
    %c0_i32 = arith.constant 0 : i32
    %c0_i32_0 = arith.constant 0 : i32
    %c0_i32_1 = arith.constant 0 : i32
    return %c0_i32, %c0_i32_0 : i32, i32
  }
  func.func @transform_7(%arg0: i32) -> (i32, i32) {
    %c0_i32 = arith.constant 0 : i32
    %c0_i32_0 = arith.constant 0 : i32
    %c0_i32_1 = arith.constant 0 : i32
    return %c0_i32, %c0_i32_0 : i32, i32
  }
  func.func @transform_8(%arg0: i32) -> (i32, i32) {
    %c0_i32 = arith.constant 0 : i32
    %c0_i32_0 = arith.constant 0 : i32
    return %arg0, %c0_i32 : i32, i32
  }
}

</mosaic_0001>

<bundles_post_ra>
// kernel: tpu_custom_call.1
= control target key start
LH: loop header
LB: loop body
LE: loop exit
PB: predicated region body
PF: predicated region fallthrough
CT: control target
= control target key end

     0   :  { %13 = vsyncpa [#allocation3], 0  ;;  %s1624_s0 = inlined_call_operand.hbm [shape: bf16[16,384], index: 0, kind: input, shape index: {}]   ;;  %s1625_s1 = inlined_call_operand.hbm [shape: bf16[16,384], index: 1, kind: input, shape index: {}]   ;;  %s1626_s2 = inlined_call_operand.hbm [shape: bf16[384,256], index: 2, kind: input, shape index: {}]   ;;  %s1627_s3 = inlined_call_operand.vmem [shape: f32[1,256], index: 3, kind: input, shape index: {}]   ;;  %s1628_s4 = inlined_call_operand.hbm [shape: bf16[256,256], index: 4, kind: input, shape index: {}]   ;;  %s1629_s5 = inlined_call_operand.vmem [shape: f32[1,256], index: 5, kind: input, shape index: {}]   ;;  %s1630_s6 = inlined_call_operand.hbm [shape: bf16[256,128], index: 6, kind: input, shape index: {}]   ;;  %s1631_s7 = inlined_call_operand.vmem [shape: f32[1,128], index: 7, kind: input, shape index: {}]   ;;  %s1632_s8 = inlined_call_operand.vmem [shape: f32[16,1], index: 8, kind: output, shape index: {}]  }
   0x1   :  { %14 = vsyncpa [#allocation5], 0 }
   0x2   :  { %15 = vsyncpa [#allocation8], 0  ;;  %s1468_s27 = smov [#allocation4]   ;;  %s1352_s9 = scalar_lea.hbm %s1625_s1, 384 }
   0x3   :  { %s33_s28 = sshll.u32 %s1468_s27, 4  ;;  %p1353_p0 = scmp.ne.s32.totalorder %s1625_s1, %s1352_s9  ;;  %s34_s28 = int_to_ptr.vmem [resolvable:$true] %s33_s28 }
   0x4   :  { %p1356_p1 = scmp.lt.u32.totalorder %s1352_s9, %s1625_s1 }
   0x6   :  { %p1358_p2 = pnand %p1356_p1, %p1353_p0 }
   0x8   :  { %1361 = shalt.err (!%p1358_p2)
}
   0x9   :  { %s1362_s14 = scalar_lea.vmem %s34_s28, 384  ;;  %p1367_p4 = scmp.lt.s32.totalorder %s34_s28, %s34_s28 }
   0xa   :  { %p1363_p3 = scmp.ne.s32.totalorder %s34_s28, %s1362_s14  ;;  %p1368_p5 = scmp.lt.s32.totalorder %s1362_s14, %s1362_s14 }
   0xc   :  { %p1369_p6 = por %p1368_p5, %p1367_p4 }
   0xe   :  { %p1370_p7 = pnand %p1369_p6, %p1363_p3 }
  0x10   :  { %1373 = shalt.err (!%p1370_p7)
}
  0x11   :  { %s1469_s15 = smov 192   ;;  %s1470_s16 = smov 12  }
  0x12   :  { %39 = dma.hbm_to_vmem [thread:$0]  %s1625_s1, 384, %s34_s28, [#allocation5], %s1469_s15, %s1469_s15, %s1470_s16  }
  0x13   :  { %s1471_s19 = smov [#allocation7]   ;;  %s1472_s21 = smov [#allocation2]  }
  0x14   :  { %s59_s20 = sshll.u32 %s1471_s19, 4  ;;  %s21_s22 = sshll.u32 %s1472_s21, 4  ;;  %s60_s20 = int_to_ptr.vmem [resolvable:$true] %s59_s20  ;;  %s22_s22 = int_to_ptr.vmem [resolvable:$true] %s21_s22 }
  0x15   :  { %s1374_s25 = scalar_lea.hbm %s1628_s4, 4096 }
  0x16   :  { %p1375_p8 = scmp.ne.s32.totalorder %s1628_s4, %s1374_s25  ;;  %p1378_p9 = scmp.lt.u32.totalorder %s1374_s25, %s1628_s4 }
  0x18   :  { %p1380_p10 = pnand %p1378_p9, %p1375_p8 }
  0x1a   :  { %1383 = shalt.err (!%p1380_p10)
}
  0x1b   :  { %s1384_s1 = scalar_lea.vmem %s60_s20, 4096  ;;  %p1389_p12 = scmp.lt.s32.totalorder %s60_s20, %s60_s20 }
  0x1c   :  { %p1385_p11 = scmp.ne.s32.totalorder %s60_s20, %s1384_s1  ;;  %p1390_p13 = scmp.lt.s32.totalorder %s1384_s1, %s1384_s1 }
  0x1e   :  { %p1391_p0 = por %p1390_p13, %p1389_p12 }
  0x20   :  { %p1392_p1 = pnand %p1391_p0, %p1385_p11 }
  0x22   :  { %1395 = shalt.err (!%p1392_p1)
}
  0x23   :  { %s1473_s28 = smov 128   ;;  %s1474_s9 = smov 8  }
  0x24   :  { %65 = dma.hbm_to_vmem [thread:$0]  %s1628_s4, 4096, %s60_s20, [#allocation8], %s1473_s28, %s1473_s28, %s1474_s9  }
  0x25   :  { %s1396_s14 = scalar_lea.hbm %s1624_s0, 384 }
  0x26   :  { %p1397_p2 = scmp.ne.s32.totalorder %s1624_s0, %s1396_s14  ;;  %p1400_p3 = scmp.lt.u32.totalorder %s1396_s14, %s1624_s0 }
  0x28   :  { %p1402_p4 = pnand %p1400_p3, %p1397_p2 }
  0x2a   :  { %1405 = shalt.err (!%p1402_p4)
}
  0x2b   :  { %s1406_s23 = scalar_lea.vmem %s22_s22, 384  ;;  %p1411_p6 = scmp.lt.s32.totalorder %s22_s22, %s22_s22 }
  0x2c   :  { %p1407_p5 = scmp.ne.s32.totalorder %s22_s22, %s1406_s23  ;;  %p1412_p7 = scmp.lt.s32.totalorder %s1406_s23, %s1406_s23 }
  0x2e   :  { %p1413_p8 = por %p1412_p7, %p1411_p6 }
  0x30   :  { %p1414_p9 = pnand %p1413_p8, %p1407_p5 }
  0x32   :  { %1417 = shalt.err (!%p1414_p9)
}
  0x33   :  { %27 = dma.hbm_to_vmem [thread:$0]  %s1624_s0, 384, %s22_s22, [#allocation3], %s1469_s15, %s1469_s15, %s1470_s16  }
  0x34   :  { %s1475_s24 = smov [#allocation6]   ;;  %s1476_s26 = smov [#allocation9]  }
  0x35   :  { %s45_s25 = sshll.u32 %s1475_s24, 4  ;;  %s73_s27 = sshll.u32 %s1476_s26, 4  ;;  %s46_s25 = int_to_ptr.vmem [resolvable:$true] %s45_s25  ;;  %s74_s27 = int_to_ptr.vmem [resolvable:$true] %s73_s27 }
  0x36   :  { %s1418_s1 = scalar_lea.hbm %s1626_s2, 6144 }
  0x37   :  { %p1419_p10 = scmp.ne.s32.totalorder %s1626_s2, %s1418_s1  ;;  %p1422_p11 = scmp.lt.u32.totalorder %s1418_s1, %s1626_s2 }
  0x39   :  { %p1424_p12 = pnand %p1422_p11, %p1419_p10 }
  0x3b   :  { %1427 = shalt.err (!%p1424_p12)
}
  0x3c   :  { %s1428_s0 = scalar_lea.vmem %s46_s25, 6144  ;;  %p1433_p0 = scmp.lt.s32.totalorder %s46_s25, %s46_s25 }
  0x3d   :  { %p1429_p13 = scmp.ne.s32.totalorder %s46_s25, %s1428_s0  ;;  %p1434_p1 = scmp.lt.s32.totalorder %s1428_s0, %s1428_s0 }
  0x3f   :  { %p1435_p2 = por %p1434_p1, %p1433_p0 }
  0x41   :  { %p1436_p3 = pnand %p1435_p2, %p1429_p13 }
  0x43   :  { %1439 = shalt.err (!%p1436_p3)
}
  0x44   :  { %51 = dma.hbm_to_vmem [thread:$0]  %s1626_s2, 6144, %s46_s25, [#allocation5], %s1473_s28, %s1473_s28, %s1474_s9  }
  0x45   :  { %s1440_s17 = scalar_lea.hbm %s1630_s6, 2048 }
  0x46   :  { %p1441_p4 = scmp.ne.s32.totalorder %s1630_s6, %s1440_s17  ;;  %p1444_p5 = scmp.lt.u32.totalorder %s1440_s17, %s1630_s6 }
  0x48   :  { %p1446_p6 = pnand %p1444_p5, %p1441_p4 }
  0x4a   :  { %1449 = shalt.err (!%p1446_p6)
}
  0x4b   :  { %s1450_s4 = scalar_lea.vmem %s74_s27, 2048  ;;  %p1455_p8 = scmp.lt.s32.totalorder %s74_s27, %s74_s27 }
  0x4c   :  { %p1451_p7 = scmp.ne.s32.totalorder %s74_s27, %s1450_s4  ;;  %p1456_p9 = scmp.lt.s32.totalorder %s1450_s4, %s1450_s4 }
  0x4e   :  { %p1457_p10 = por %p1456_p9, %p1455_p8 }
  0x50   :  { %p1458_p11 = pnand %p1457_p10, %p1451_p7 }
  0x52   :  { %1461 = shalt.err (!%p1458_p11)
}
  0x53   :  { %s1477_s2 = smov 64   ;;  %s1478_s28 = smov 4  }
  0x54   :  { %79 = dma.hbm_to_vmem [thread:$0]  %s1630_s6, 2048, %s74_s27, [#allocation8], %s1477_s2, %s1477_s2, %s1478_s28  }
  0x55   :  { %1462 = dma.done.wait [#allocation3], 384  }
  0x56   :  { %1463 = vsyncadd [#allocation3], 4294966912 }
  0x57   :  { %1464 = dma.done.wait [#allocation5], 6528  }
  0x58   :  { %1465 = vsyncadd [#allocation5], 4294960768 }
  0x59   :  { %1466 = dma.done.wait [#allocation8], 6144  }
  0x5a   :  { %1467 = vsyncadd [#allocation8], 4294961152  ;;  %v1204_v0 = vld [vmem:[#allocation6 + $0x4] ss:$8 sps:$4 sm:$0xff]   ;;  %v1206_v1 = vld [vmem:[#allocation6] ss:$8 sps:$4 sm:$0xff]  }
  0x5b   :  { %438 = vmatprep.subr.bf16.mxu0 %v1204_v0  ;;  %v1207_v2 = vld [vmem:[#allocation6 + $0x14] ss:$8 sps:$4 sm:$0xff]   ;;  %v1209_v3 = vld [vmem:[#allocation6 + $0x10] ss:$8 sps:$4 sm:$0xff]   ;;  %v1210_v4 = vld [vmem:[#allocation6 + $0x24] ss:$8 sps:$4 sm:$0xff]  }
  0x5c   :  { %439 = vmatpush1.bf16.msra.mxu0 %v1206_v1  ;;  %v1212_v5 = vld [vmem:[#allocation6 + $0x20] ss:$8 sps:$4 sm:$0xff]   ;;  %v1213_v6 = vld [vmem:[#allocation6 + $0x34] ss:$8 sps:$4 sm:$0xff]   ;;  %v1215_v7 = vld [vmem:[#allocation6 + $0x30] ss:$8 sps:$4 sm:$0xff]  }
  0x5d   :  { %440 = vmatprep.subr.bf16.mxu0 %v1207_v2  ;;  %v1216_v8 = vld [vmem:[#allocation6 + $0x44] ss:$8 sps:$4 sm:$0xff]   ;;  %v1218_v9 = vld [vmem:[#allocation6 + $0x40] ss:$8 sps:$4 sm:$0xff]   ;;  %v1219_v10 = vld [vmem:[#allocation6 + $0x54] ss:$8 sps:$4 sm:$0xff]  }
  0x5e   :  { %v1221_v11 = vld [vmem:[#allocation6 + $0x50] ss:$8 sps:$4 sm:$0xff]   ;;  %v1222_v12 = vld [vmem:[#allocation6 + $0x64] ss:$8 sps:$4 sm:$0xff]   ;;  %v1254_v13 = vld [vmem:[#allocation2 + $0x4] ss:$12 sps:$4 sm:$0xff]  }
  0x5f   :  { %v1224_v14 = vld [vmem:[#allocation6 + $0x60] ss:$8 sps:$4 sm:$0xff]   ;;  %v1225_v15 = vld [vmem:[#allocation6 + $0x74] ss:$8 sps:$4 sm:$0xff]   ;;  %470 = vmatprep.mubr.bf16.mxu0 %v1254_v13  ;;  %v1227_v16 = vld [vmem:[#allocation6 + $0x70] ss:$8 sps:$4 sm:$0xff]  }
  0x60   :  { %441 = vmatpush1.bf16.msra.mxu0 %v1209_v3  ;;  %v1228_v17 = vld [vmem:[#allocation6 + $0x84] ss:$8 sps:$4 sm:$0xff]   ;;  %v1230_v18 = vld [vmem:[#allocation6 + $0x80] ss:$8 sps:$4 sm:$0xff]   ;;  %v1231_v19 = vld [vmem:[#allocation6 + $0x94] ss:$8 sps:$4 sm:$0xff]  }
  0x61   :  { %442 = vmatprep.subr.bf16.mxu0 %v1210_v4  ;;  %v1233_v20 = vld [vmem:[#allocation6 + $0x90] ss:$8 sps:$4 sm:$0xff]   ;;  %v1234_v21 = vld [vmem:[#allocation6 + $0xa4] ss:$8 sps:$4 sm:$0xff]   ;;  %v1286_v23 = vld [vmem:[#allocation7] ss:$8 sps:$4 sm:$0xff]  }
  0x62   :  { %v1284_v22 = vld [vmem:[#allocation7 + $0x4] ss:$8 sps:$4 sm:$0xff]   ;;  %v1287_v24 = vld [vmem:[#allocation7 + $0x14] ss:$8 sps:$4 sm:$0xff]   ;;  %v1236_v25 = vld [vmem:[#allocation6 + $0xa0] ss:$8 sps:$4 sm:$0xff]  }
  0x63   :  { %760 = vmatprep.subr.bf16.mxu1 %v1284_v22  ;;  %v1237_v26 = vld [vmem:[#allocation6 + $0xb4] ss:$8 sps:$4 sm:$0xff]   ;;  %v1289_v27 = vld [vmem:[#allocation7 + $0x10] ss:$8 sps:$4 sm:$0xff]   ;;  %v1290_v28 = vld [vmem:[#allocation7 + $0x24] ss:$8 sps:$4 sm:$0xff]  }
  0x64   :  { %443 = vmatpush1.bf16.msra.mxu0 %v1212_v5  ;;  %761 = vmatpush1.bf16.msra.mxu1 %v1286_v23  ;;  %v1239_v29 = vld [vmem:[#allocation6 + $0xb0] ss:$8 sps:$4 sm:$0xff]   ;;  %v1240_v30 = vld [vmem:[#allocation6 + $0xc4] ss:$8 sps:$4 sm:$0xff]   ;;  %v1292_v31 = vld [vmem:[#allocation7 + $0x20] ss:$8 sps:$4 sm:$0xff]  }
  0x65   :  { %444 = vmatprep.subr.bf16.mxu0 %v1213_v6  ;;  %762 = vmatprep.subr.bf16.mxu1 %v1287_v24  ;;  %v1293_v32 = vld [vmem:[#allocation7 + $0x34] ss:$8 sps:$4 sm:$0xff]   ;;  %v1242_v33 = vld [vmem:[#allocation6 + $0xc0] ss:$8 sps:$4 sm:$0xff]   ;;  %v1295_v35 = vld [vmem:[#allocation7 + $0x30] ss:$8 sps:$4 sm:$0xff]   ;;  %v188_v24 = vlaneseq }
  0x66   :  { %v1243_v34 = vld [vmem:[#allocation6 + $0xd4] ss:$8 sps:$4 sm:$0xff]   ;;  %v1296_v36 = vld [vmem:[#allocation7 + $0x44] ss:$8 sps:$4 sm:$0xff]   ;;  %v1245_v37 = vld [vmem:[#allocation6 + $0xd0] ss:$8 sps:$4 sm:$0xff]  }
  0x67   :  { %v1246_v38 = vld [vmem:[#allocation6 + $0xe4] ss:$8 sps:$4 sm:$0xff]   ;;  %v1298_v39 = vld [vmem:[#allocation7 + $0x40] ss:$8 sps:$4 sm:$0xff]   ;;  %v1299_v41 = vld [vmem:[#allocation7 + $0x54] ss:$8 sps:$4 sm:$0xff]  }
  0x68   :  { %445 = vmatpush1.bf16.msra.mxu0 %v1215_v7  ;;  %763 = vmatpush1.bf16.msra.mxu1 %v1289_v27  ;;  %v1248_v40 = vld [vmem:[#allocation6 + $0xe0] ss:$8 sps:$4 sm:$0xff]   ;;  %v1249_v42 = vld [vmem:[#allocation6 + $0xf4] ss:$8 sps:$4 sm:$0xff]   ;;  %v1301_v43 = vld [vmem:[#allocation7 + $0x50] ss:$8 sps:$4 sm:$0xff]  }
  0x69   :  { %446 = vmatprep.subr.bf16.mxu0 %v1216_v8  ;;  %764 = vmatprep.subr.bf16.mxu1 %v1290_v28  ;;  %v1302_v44 = vld [vmem:[#allocation7 + $0x64] ss:$8 sps:$4 sm:$0xff]   ;;  %v1251_v45 = vld [vmem:[#allocation6 + $0xf0] ss:$8 sps:$4 sm:$0xff]   ;;  %v1304_v47 = vld [vmem:[#allocation7 + $0x60] ss:$8 sps:$4 sm:$0xff]  }
  0x6a   :  { %v1257_v46 = vld [vmem:[#allocation6 + $0x104] ss:$8 sps:$4 sm:$0xff]   ;;  %v1305_v48 = vld [vmem:[#allocation7 + $0x74] ss:$8 sps:$4 sm:$0xff]   ;;  %v1255_v50 = vld [vmem:[#allocation6 + $0x100] ss:$8 sps:$4 sm:$0xff]  }
  0x6b   :  { %v1252_v49 = vld [vmem:[#allocation2] ss:$12 sps:$4 sm:$0xff]   ;;  %v1273_v51 = vld [vmem:[#allocation4 + $0x4] ss:$12 sps:$4 sm:$0xff]   ;;  %v1310_v57 = vld [vmem:[#allocation7 + $0x80] ss:$8 sps:$4 sm:$0xff]  }
  0x6c   :  { %447 = vmatpush1.bf16.msra.mxu0 %v1218_v9  ;;  %765 = vmatpush1.bf16.msra.mxu1 %v1292_v31  ;;  %v1260_v52 = vld [vmem:[#allocation6 + $0x114] ss:$8 sps:$4 sm:$0xff]   ;;  %v1307_v53 = vld [vmem:[#allocation7 + $0x70] ss:$8 sps:$4 sm:$0xff]   ;;  %v1308_v54 = vld [vmem:[#allocation7 + $0x84] ss:$8 sps:$4 sm:$0xff]  }
  0x6d   :  { %448 = vmatprep.subr.bf16.mxu0 %v1219_v10  ;;  %766 = vmatprep.subr.bf16.mxu1 %v1293_v32  ;;  %v1258_v55 = vld [vmem:[#allocation6 + $0x110] ss:$8 sps:$4 sm:$0xff]   ;;  %v1263_v56 = vld [vmem:[#allocation6 + $0x124] ss:$8 sps:$4 sm:$0xff]   ;;  %v1311_v58 = vld [vmem:[#allocation7 + $0x94] ss:$8 sps:$4 sm:$0xff]  }
  0x6e   :  { %v1275_v59 = vld [vmem:[#allocation4] ss:$12 sps:$4 sm:$0xff]   ;;  %v1313_v62 = vld [vmem:[#allocation7 + $0x90] ss:$8 sps:$4 sm:$0xff]   ;;  %v1314_v63 = vld [vmem:[#allocation7 + $0xa4] ss:$8 sps:$4 sm:$0xff]  }
  0x6f   :  { %v1261_v60 = vld [vmem:[#allocation6 + $0x120] ss:$8 sps:$4 sm:$0xff]   ;;  %v1266_v61 = vld [vmem:[#allocation6 + $0x134] ss:$8 sps:$4 sm:$0xff]   ;;  %v1264_v0 = vld [vmem:[#allocation6 + $0x130] ss:$8 sps:$4 sm:$0xff]  }
  0x70   :  { %449 = vmatpush1.bf16.msra.mxu0 %v1221_v11  ;;  %767 = vmatpush1.bf16.msra.mxu1 %v1295_v35  ;;  %v1479_v1 = vmov 0   ;;  %v1269_v2 = vld [vmem:[#allocation6 + $0x144] ss:$8 sps:$4 sm:$0xff]   ;;  %v1316_v3 = vld [vmem:[#allocation7 + $0xa0] ss:$8 sps:$4 sm:$0xff]   ;;  %vm1035_vm0 = vcmask 7168  }
  0x71   :  { %450 = vmatprep.subr.bf16.mxu0 %v1222_v12  ;;  %768 = vmatprep.subr.bf16.mxu1 %v1296_v36  ;;  %v1317_v4 = vld [vmem:[#allocation7 + $0xb4] ss:$8 sps:$4 sm:$0xff]   ;;  %v1267_v5 = vld [vmem:[#allocation6 + $0x140] ss:$8 sps:$4 sm:$0xff]   ;;  %v1319_v7 = vld [vmem:[#allocation7 + $0xb0] ss:$8 sps:$4 sm:$0xff]  }
  0x72   :  { %v1272_v6 = vld [vmem:[#allocation6 + $0x154] ss:$8 sps:$4 sm:$0xff]   ;;  %v1320_v8 = vld [vmem:[#allocation7 + $0xc4] ss:$8 sps:$4 sm:$0xff]   ;;  %v1270_v9 = vld [vmem:[#allocation6 + $0x150] ss:$8 sps:$4 sm:$0xff]  }
  0x73   :  { %v1278_v10 = vld [vmem:[#allocation6 + $0x164] ss:$8 sps:$4 sm:$0xff]   ;;  %v1322_v11 = vld [vmem:[#allocation7 + $0xc0] ss:$8 sps:$4 sm:$0xff]   ;;  %v1323_v12 = vld [vmem:[#allocation7 + $0xd4] ss:$8 sps:$4 sm:$0xff]  }
  0x74   :  { %451 = vmatpush1.bf16.msra.mxu0 %v1224_v14  ;;  %769 = vmatpush1.bf16.msra.mxu1 %v1298_v39  ;;  %v1276_v13 = vld [vmem:[#allocation6 + $0x160] ss:$8 sps:$4 sm:$0xff]   ;;  %v1281_v14 = vld [vmem:[#allocation6 + $0x174] ss:$8 sps:$4 sm:$0xff]   ;;  %v1331_v22 = vld [vmem:[#allocation7 + $0xf0] ss:$8 sps:$4 sm:$0xff]  }
  0x75   :  { %452 = vmatprep.subr.bf16.mxu0 %v1225_v15  ;;  %770 = vmatprep.subr.bf16.mxu1 %v1299_v41  ;;  %v1279_v15 = vld [vmem:[#allocation6 + $0x170] ss:$8 sps:$4 sm:$0xff]   ;;  %v1332_v23 = vld [vmem:[#allocation9 + $0x40] sm:$0xff]  }
  0x76   :  { %v186_v27 = vld [vmem:[%s1627_s3] sm:$0x3] }
  0x78   :  { %453 = vmatpush1.bf16.msra.mxu0 %v1227_v16  ;;  %771 = vmatpush1.bf16.msra.mxu1 %v1301_v43  ;;  %v1282_v16 = vld [vmem:[#allocation2 + $0x8] ss:$12 sps:$4 sm:$0xff]  }
  0x79   :  { %454 = vmatprep.subr.bf16.mxu0 %v1228_v17  ;;  %772 = vmatprep.subr.bf16.mxu1 %v1302_v44  ;;  %v1283_v17 = vld [vmem:[#allocation4 + $0x8] ss:$12 sps:$4 sm:$0xff]  }
  0x7c   :  { %455 = vmatpush1.bf16.msra.mxu0 %v1230_v18  ;;  %773 = vmatpush1.bf16.msra.mxu1 %v1304_v47  ;;  %v1325_v18 = vld [vmem:[#allocation7 + $0xd0] ss:$8 sps:$4 sm:$0xff]  }
  0x7d   :  { %456 = vmatprep.subr.bf16.mxu0 %v1231_v19  ;;  %774 = vmatprep.subr.bf16.mxu1 %v1305_v48  ;;  %v1326_v19 = vld [vmem:[#allocation7 + $0xe4] ss:$8 sps:$4 sm:$0xff]  }
  0x80   :  { %457 = vmatpush1.bf16.msra.mxu0 %v1233_v20  ;;  %775 = vmatpush1.bf16.msra.mxu1 %v1307_v53  ;;  %v1328_v20 = vld [vmem:[#allocation7 + $0xe0] ss:$8 sps:$4 sm:$0xff]  }
  0x81   :  { %458 = vmatprep.subr.bf16.mxu0 %v1234_v21  ;;  %776 = vmatprep.subr.bf16.mxu1 %v1308_v54  ;;  %v1329_v21 = vld [vmem:[#allocation7 + $0xf4] ss:$8 sps:$4 sm:$0xff]  }
  0x84   :  { %459 = vmatpush1.bf16.msra.mxu0 %v1236_v25  ;;  %777 = vmatpush1.bf16.msra.mxu1 %v1310_v57  ;;  %v1597_v25 = vshrl.u32 %v188_v24, 7 }
  0x85   :  { %460 = vmatprep.subr.bf16.mxu0 %v1237_v26  ;;  %778 = vmatprep.subr.bf16.mxu1 %v1311_v58  ;;  %v1336_v58 = vld [vmem:[#allocation9 + $0x50] sm:$0xff]  }
  0x86   :  { %v190_v26 = vsub.s32 0, %v1597_v25  ;;  %v194_v28 = vsub.s32 1, %v1597_v25 }
  0x88   :  { %461 = vmatpush1.bf16.msra.mxu0 %v1239_v29  ;;  %779 = vmatpush1.bf16.msra.mxu1 %v1313_v62  ;;  %v191_v29 = vrot.slane %v186_v27, %v190_v26 }
  0x89   :  { %462 = vmatprep.subr.bf16.mxu0 %v1240_v30  ;;  %780 = vmatprep.subr.bf16.mxu1 %v1314_v63  ;;  %v195_v30 = vrot.slane %v186_v27, %v194_v28  ;;  %v1337_v63 = vld [vmem:[#allocation9 + $0x10] sm:$0xff]  }
  0x8c   :  { %463 = vmatpush1.bf16.msra.mxu0 %v1242_v33  ;;  %781 = vmatpush1.bf16.msra.mxu1 %v1316_v3  ;;  %v1341_v3 = vld [vmem:[#allocation9 + $0x20] sm:$0xff]  }
  0x8d   :  { %464 = vmatprep.subr.bf16.mxu0 %v1243_v34  ;;  %782 = vmatprep.subr.bf16.mxu1 %v1317_v4  ;;  %v1342_v4 = vld [vmem:[#allocation9 + $0x68] sm:$0xff]  }
  0x90   :  { %465 = vmatpush1.bf16.msra.mxu0 %v1245_v37  ;;  %783 = vmatpush1.bf16.msra.mxu1 %v1319_v7  ;;  %v1345_v7 = vld [vmem:[#allocation9 + $0x30] sm:$0xff]  }
  0x91   :  { %466 = vmatprep.subr.bf16.mxu0 %v1246_v38  ;;  %784 = vmatprep.subr.bf16.mxu1 %v1320_v8  ;;  %v1346_v8 = vld [vmem:[#allocation9 + $0x78] sm:$0xff]  }
  0x94   :  { %467 = vmatpush1.bf16.msra.mxu0 %v1248_v40  ;;  %785 = vmatpush1.bf16.msra.mxu1 %v1322_v11 }
  0x95   :  { %468 = vmatprep.subr.bf16.mxu0 %v1249_v42  ;;  %786 = vmatprep.subr.bf16.mxu1 %v1323_v12 }
  0x98   :  { %469 = vmatpush1.bf16.msra.mxu0 %v1251_v45  ;;  %787 = vmatpush1.bf16.msra.mxu1 %v1325_v18 }
  0x99   :  { %491 = vmatprep.subr.bf16.mxu0 %v1257_v46  ;;  %788 = vmatprep.subr.bf16.mxu1 %v1326_v19  ;;  %v1333_v46 = vld [vmem:[#allocation9] sm:$0xff]  }
  0x9b   :  { %471 = vmatmul.mubr.bf16.vlgmr.msra.gmra.mrb[0].mxu0 %v1252_v49  ;;  %v1334_v49 = vld [vmem:[#allocation9 + $0x48] sm:$0xff]  }
  0x9c   :  { %492 = vmatpush1.bf16.msra.mxu0 %v1255_v50  ;;  %480 = vmatprep.mubr.bf16.mxu0 %v1273_v51 }
  0x9d   :  { %493 = vmatprep.subr.bf16.mxu0 %v1260_v52  ;;  %789 = vmatpush1.bf16.msra.mxu1 %v1328_v20 }
  0x9e   :  { %790 = vmatprep.subr.bf16.mxu1 %v1329_v21 }
  0xa0   :  { %494 = vmatpush1.bf16.msra.mxu0 %v1258_v55  ;;  %v1335_v55 = vld [vmem:[#allocation9 + $0x8] sm:$0xff]  }
  0xa1   :  { %495 = vmatprep.subr.bf16.mxu0 %v1263_v56  ;;  %791 = vmatpush1.bf16.msra.mxu1 %v1331_v22 }
  0xa2   :  { %1148 = vmatprep.subr.bf16.mxu1 %v1332_v23 }
  0xa3   :  { %481 = vmatmul.mubr.bf16.gmra.mrb[4].mxu0 %v1275_v59 }
  0xa4   :  { %496 = vmatpush1.bf16.msra.mxu0 %v1261_v60  ;;  %523 = vmatprep.mubr.bf16.mxu0 %v1479_v1 }
  0xa5   :  { %497 = vmatprep.subr.bf16.mxu0 %v1266_v61 }
  0xa8   :  { %498 = vmatpush1.bf16.msra.mxu0 %v1264_v0  ;;  %v1338_v0 = vld [vmem:[#allocation9 + $0x58] sm:$0xff]  }
  0xa9   :  { %499 = vmatprep.subr.bf16.mxu0 %v1269_v2  ;;  %v1340_v2 = vld [vmem:[#allocation9 + $0x60] sm:$0xff]  }
  0xac   :  { %500 = vmatpush1.bf16.msra.mxu0 %v1267_v5  ;;  %v1343_v5 = vld [vmem:[#allocation9 + $0x28] sm:$0xff]  }
  0xad   :  { %501 = vmatprep.subr.bf16.mxu0 %v1272_v6  ;;  %v1344_v6 = vld [vmem:[#allocation9 + $0x70] sm:$0xff]  }
  0xb0   :  { %502 = vmatpush1.bf16.msra.mxu0 %v1270_v9  ;;  %v1347_v9 = vld [vmem:[#allocation9 + $0x38] sm:$0xff]  }
  0xb1   :  { %503 = vmatprep.subr.bf16.mxu0 %v1278_v10  ;;  %v588_v10 = vld [vmem:[%s1629_s5] sm:$0x3] }
  0xb2   :  { %v593_v11 = vrot.slane %v588_v10, %v190_v26  ;;  %v597_v12 = vrot.slane %v588_v10, %v194_v28 }
  0xb4   :  { %504 = vmatpush1.bf16.msra.mxu0 %v1276_v13 }
  0xb5   :  { %505 = vmatprep.subr.bf16.mxu0 %v1281_v14 }
  0xb8   :  { %506 = vmatpush1.bf16.msra.mxu0 %v1279_v15 }
  0xbb   :  { %524 = vmatmul.mubr.bf16.vlgmr.msra.gmra.mrb[0].mxu0 %v1282_v16 }
  0xbc   :  { %533 = vmatprep.mubr.bf16.mxu0 %v1479_v1  ;;  %v1339_v1 = vld [vmem:[#allocation9 + $0x18] sm:$0xff]  }
  0xc3   :  { %534 = vmatmul.mubr.bf16.gmra.mrb[4].mxu0 %v1283_v17 }
 0x18e   :  { %v525_v31 = vpop.f32.mrb[0].mxu0 }
 0x18f   :  { %v1176_v32 = vadd.f32 %v525_v31, %v191_v29  ;;  %v527_v33 = vpop.f32.mrb[1].mxu0 }
 0x190   :  { %v1177_v34 = vadd.f32 %v527_v33, %v195_v30  ;;  %v529_v35 = vpop.f32.mrb[2].mxu0 }
 0x191   :  { %v1178_v36 = vadd.f32 %v529_v35, %v191_v29  ;;  %v531_v37 = vpop.f32.mrb[3].mxu0  ;;  %v544_v39 = vmax.f32 %v1176_v32, 0.0 }
 0x192   :  { %v1179_v38 = vadd.f32 %v531_v37, %v195_v30  ;;  %v545_v41 = vmax.f32 %v1177_v34, 0.0 }
 0x193   :  { %v546_v40 = vmax.f32 %v1178_v36, 0.0 }
 0x194   :  { %v547_v42 = vmax.f32 %v1179_v38, 0.0 }
 0x195   :  { %v552_v43 = vpack.c.bf16 %v546_v40, %v544_v39 }
 0x196   :  { %v535_v44 = vpop.f32.mrb[4].mxu0  ;;  %v553_v45 = vpack.c.bf16 %v547_v42, %v545_v41 }
 0x197   :  { %v1180_v47 = vadd.f32 %v535_v44, %v191_v29  ;;  %v537_v48 = vpop.f32.mrb[5].mxu0 }
 0x198   :  { %v1181_v50 = vadd.f32 %v537_v48, %v195_v30  ;;  %v539_v51 = vpop.f32.mrb[6].mxu0  ;;  %792 = vmatprep.mubr.bf16.mxu1 %v553_v45 }
 0x199   :  { %v1182_v52 = vadd.f32 %v539_v51, %v191_v29  ;;  %v541_v53 = vpop.f32.mrb[7].mxu0  ;;  %793 = vmatmul.mubr.bf16.vlgmr.msra.gmra.mrb[0].mxu1 %v552_v43  ;;  %v548_v56 = vmax.f32 %v1180_v47, 0.0  ;;  %v1131_v43 = vld [vmem:[%s1631_s7] ss:$0 sm:$0xff] }
 0x19a   :  { %v1183_v54 = vadd.f32 %v541_v53, %v195_v30  ;;  %1149 = vmatpush3.bf16.msra.mxu1 %v1333_v46  ;;  %v549_v59 = vmax.f32 %v1181_v50, 0.0 }
 0x19b   :  { %v550_v57 = vmax.f32 %v1182_v52, 0.0  ;;  %1150 = vmatprep.subr.bf16.mxu1 %v1334_v49 }
 0x19c   :  { %v551_v60 = vmax.f32 %v1183_v54, 0.0 }
 0x19d   :  { %v554_v61 = vpack.c.bf16 %v550_v57, %v548_v56 }
 0x19e   :  { %v555_v62 = vpack.c.bf16 %v551_v60, %v549_v59  ;;  %1151 = vmatpush3.bf16.msra.mxu1 %v1335_v55 }
 0x19f   :  { %1152 = vmatprep.subr.bf16.mxu1 %v1336_v58 }
 0x1a0   :  { %802 = vmatprep.mubr.bf16.mxu1 %v555_v62 }
 0x1a1   :  { %803 = vmatmul.mubr.bf16.gmra.mrb[4].mxu1 %v554_v61 }
 0x1a2   :  { %1153 = vmatpush3.bf16.msra.mxu1 %v1337_v63 }
 0x1a3   :  { %1154 = vmatprep.subr.bf16.mxu1 %v1338_v0 }
 0x1a6   :  { %1155 = vmatpush3.bf16.msra.mxu1 %v1339_v1 }
 0x1a7   :  { %1156 = vmatprep.subr.bf16.mxu1 %v1340_v2 }
 0x1aa   :  { %1157 = vmatpush3.bf16.msra.mxu1 %v1341_v3 }
 0x1ab   :  { %1158 = vmatprep.subr.bf16.mxu1 %v1342_v4 }
 0x1ae   :  { %1159 = vmatpush3.bf16.msra.mxu1 %v1343_v5 }
 0x1af   :  { %1160 = vmatprep.subr.bf16.mxu1 %v1344_v6 }
 0x1b2   :  { %1161 = vmatpush3.bf16.msra.mxu1 %v1345_v7 }
 0x1b3   :  { %1162 = vmatprep.subr.bf16.mxu1 %v1346_v8 }
 0x1b6   :  { %1163 = vmatpush3.bf16.msra.mxu1 %v1347_v9 }
 0x26c   :  { %v794_v13 = vpop.f32.mrb[0].mxu1 }
 0x26d   :  { %v795_v14 = vadd.f32 %v794_v13, %v593_v11  ;;  %v796_v15 = vpop.f32.mrb[1].mxu1 }
 0x26e   :  { %v797_v16 = vadd.f32 %v796_v15, %v597_v12  ;;  %v798_v17 = vpop.f32.mrb[2].mxu1 }
 0x26f   :  { %v799_v18 = vadd.f32 %v798_v17, %v593_v11  ;;  %v800_v19 = vpop.f32.mrb[3].mxu1  ;;  %v813_v21 = vmax.f32 %v795_v14, 0.0 }
 0x270   :  { %v801_v20 = vadd.f32 %v800_v19, %v597_v12  ;;  %v814_v23 = vmax.f32 %v797_v16, 0.0 }
 0x271   :  { %v815_v22 = vmax.f32 %v799_v18, 0.0 }
 0x272   :  { %v816_v24 = vmax.f32 %v801_v20, 0.0 }
 0x273   :  { %v821_v27 = vpack.c.bf16 %v815_v22, %v813_v21 }
 0x274   :  { %v822_v29 = vpack.c.bf16 %v816_v24, %v814_v23  ;;  %v804_v30 = vpop.f32.mrb[4].mxu1 }
 0x275   :  { %v805_v31 = vadd.f32 %v804_v30, %v593_v11  ;;  %v806_v26 = vpop.f32.mrb[5].mxu1 }
 0x276   :  { %v807_v32 = vadd.f32 %v806_v26, %v597_v12  ;;  %v808_v25 = vpop.f32.mrb[6].mxu1  ;;  %992 = vmatprep.mubr.bf16.mxu1 %v822_v29 }
 0x277   :  { %v809_v28 = vadd.f32 %v808_v25, %v593_v11  ;;  %v810_v33 = vpop.f32.mrb[7].mxu1  ;;  %993 = vmatmul.mubr.bf16.vlgmr.msra.gmra.mrb[8].mxu1 %v821_v27  ;;  %v817_v35 = vmax.f32 %v805_v31, 0.0 }
 0x278   :  { %v811_v34 = vadd.f32 %v810_v33, %v597_v12  ;;  %v818_v37 = vmax.f32 %v807_v32, 0.0 }
 0x279   :  { %v819_v36 = vmax.f32 %v809_v28, 0.0 }
 0x27a   :  { %v820_v38 = vmax.f32 %v811_v34, 0.0 }
 0x27b   :  { %v823_v39 = vpack.c.bf16 %v819_v36, %v817_v35 }
 0x27c   :  { %v824_v40 = vpack.c.bf16 %v820_v38, %v818_v37 }
 0x27e   :  { %1000 = vmatprep.mubr.bf16.mxu1 %v824_v40 }
 0x27f   :  { %1001 = vmatmul.mubr.bf16.gmra.mrb[12].mxu1 %v823_v39 }
 0x34a   :  { %v1164_v41 = vpop.f32.mrb[8].mxu1 }
 0x34b   :  { %v1165_v42 = vpop.f32.mrb[9].mxu1 }
 0x34c   :  { %v1166_v44 = vadd.f32 %v1165_v42, %v1164_v41  ;;  %v1167_v45 = vpop.f32.mrb[10].mxu1 }
 0x34d   :  { %v1168_v46 = vpop.f32.mrb[11].mxu1 }
 0x34e   :  { %v1169_v47 = vadd.f32 %v1168_v46, %v1167_v45  ;;  %v995_v48 = vadd.f32 %v1166_v44, %v1131_v43 }
 0x350   :  { %v998_v49 = vadd.f32 %v1169_v47, %v1131_v43  ;;  %v1015_v50 = vmul.f32 %v995_v48, %v995_v48 }
 0x352   :  { %v1170_v51 = vpop.f32.mrb[12].mxu1  ;;  %1017 = vadd.xlane.f32.xlu0 %v1015_v50  ;;  %v1016_v55 = vmul.f32 %v998_v49, %v998_v49 }
 0x353   :  { %v1171_v52 = vpop.f32.mrb[13].mxu1 }
 0x354   :  { %v1172_v53 = vadd.f32 %v1171_v52, %v1170_v51  ;;  %v1173_v54 = vpop.f32.mrb[14].mxu1 }
 0x355   :  { %v1174_v56 = vpop.f32.mrb[15].mxu1 }
 0x356   :  { %v1175_v57 = vadd.f32 %v1174_v56, %v1173_v54  ;;  %1019 = vadd.xlane.f32.xlu0 %v1016_v55  ;;  %v1003_v58 = vadd.f32 %v1172_v53, %v1131_v43 }
 0x358   :  { %v1006_v59 = vadd.f32 %v1175_v57, %v1131_v43  ;;  %v1021_v60 = vmul.f32 %v1003_v58, %v1003_v58  ;;  %v1009_v61 = vmul.f32 %v1003_v58, %v995_v48 }
 0x35a   :  { %1023 = vadd.xlane.f32.xlu1 %v1021_v60  ;;  %1011 = vadd.xlane.f32.xlu0 %v1009_v61  ;;  %v1010_v62 = vmul.f32 %v1006_v59, %v998_v49  ;;  %v1022_v63 = vmul.f32 %v1006_v59, %v1006_v59 }
 0x35e   :  { %1025 = vadd.xlane.f32.xlu1 %v1022_v63 }
 0x362   :  { %1013 = vadd.xlane.f32.xlu1 %v1010_v62 }
 0x3df   :  { %v1018_v0 = vpop.xlane.xlu0 %1017 }
 0x3e3   :  { %v1020_v4 = vpop.xlane.xlu0 %1019 }
 0x3e7   :  { %v1024_v1 = vpop.xlane.xlu1 %1023  ;;  %v1012_v9 = vpop.xlane.xlu0 %1011 }
 0x3e8   :  { %v1027_v2 = vmul.f32 %v1024_v1, %v1018_v0 }
 0x3ea   :  { %v1029_v3 = vmax.f32 %v1027_v2, 1e-16 }
 0x3eb   :  { %v1026_v5 = vpop.xlane.xlu1 %1025 }
 0x3ec   :  { %1348 = vrsqrt.f32 %v1029_v3  ;;  %v1028_v6 = vmul.f32 %v1026_v5, %v1020_v4 }
 0x3ee   :  { %v1030_v7 = vmax.f32 %v1028_v6, 1e-16 }
 0x3ef   :  { %v1014_v12 = vpop.xlane.xlu1 %1013 }
 0x3f0   :  { %1350 = vrsqrt.f32 %v1030_v7 }
 0x3f6   :  { %v1349_v8 = vpop.eup %1348 }
 0x3f7   :  { %v1033_v10 = vmul.f32 %v1349_v8, %v1012_v9 }
 0x3f9   :  { %1036 = vst.msk [vmem:[%s1632_s8] sm:$0xff] %vm1035_vm0, %v1033_v10 }
 0x3fa   :  { %v1351_v11 = vpop.eup %1350 }
 0x3fb   :  { %v1034_v13 = vmul.f32 %v1351_v11, %v1014_v12 }
 0x3fd   :  { %1037 = vst.msk [vmem:[%s1632_s8 + $0x8] sm:$0xff] %vm1035_vm0, %v1034_v13 }
 0x3fe   :  { %1042 = vsyncpa [#allocation3], 1 }
 0x3ff   :  { %1043 = vsyncpa [#allocation5], 1 }
 0x400   :  { %1044 = vsyncpa [#allocation8], 1 }

</bundles_post_ra>
